<compile_context>
chip_gen: v7x
topology: tpu7x:2x2x1
jax: 0.10.0
libtpu: 0.0.40
codegen_flags: <defaults>
</compile_context>

<pallas_src>
import functools

import jax
import jax.numpy as jnp
from jax.experimental import pallas as pl
from jax.experimental.pallas import tpu as pltpu


# ----------------------------------------------------------------------------
# Kernel
# ----------------------------------------------------------------------------
def _attention_kernel(g_ref, x_ref, wg_ref, wx_ref, b_ref, wpsi_ref, bpsi_ref,
                      out_ref):
    # g_ref:    (F_g, tm)    io_dtype (bf16 or f32)    spatial on lanes
    # x_ref:    (F_l, tm)    io_dtype
    # wg_ref:   (F_int, F_g) io_dtype   (BN folded)
    # wx_ref:   (F_int, F_l) io_dtype   (BN folded)
    # b_ref:    (F_int, 1)   f32        (bg + bx combined)
    # wpsi_ref: (F_int, 1)   f32        (BN folded psi weight, column)
    # bpsi_ref: (1,)         f32 in SMEM
    # out_ref:  (F_l, tm)    io_dtype

    # Two 1x1 convs on the MXU, f32 accumulation.
    g1 = jnp.dot(wg_ref[...], g_ref[...], preferred_element_type=jnp.float32)
    x1 = jnp.dot(wx_ref[...], x_ref[...], preferred_element_type=jnp.float32)

    # relu(g1 + x1 + (bg + bx))   -> (F_int, tm), f32 on the VPU.
    a = jnp.maximum(g1 + x1 + b_ref[...], 0.0)

    # psi projection: VPU multiply + sublane (XLU) reduce, NOT an N=1 matmul.
    logit = jnp.sum(a * wpsi_ref[...], axis=0, keepdims=True) + bpsi_ref[0]
    psi = jax.nn.sigmoid(logit)                       # (1, tm), EUP

    # Gate the skip connection; lane-dense store.
    out_ref[...] = (x_ref[...].astype(jnp.float32) * psi).astype(out_ref.dtype)


# ----------------------------------------------------------------------------
# pallas_call wrapper
# ----------------------------------------------------------------------------
def _pick_tm(HWp, F_g, F_l, F_int, io_bytes, budget_bytes=20 * 1024 * 1024):
    """Largest lane-aligned spatial tile that divides the (128-padded) spatial
    extent and fits a VMEM budget conservative enough for v7x's 32 MiB default
    scoped VMEM (double-buffered g/x/out tiles + f32 intermediates)."""
    def est(t):
        return 2 * t * (F_g + 2 * F_l) * io_bytes + 4 * t * F_int * 4

    best = min(128, HWp)
    t = 128
    while t <= HWp:
        if HWp % t == 0 and est(t) <= budget_bytes:
            best = t
        t += 128
    return best


@functools.partial(jax.jit, static_argnames=("tm",))
def _attention_call(g3, x3, wg, wx, bias, wpsi, bpsi, *, tm):
    """g3: (N, F_g, HW), x3: (N, F_l, HW) -> (N, F_l, HW)."""
    N, F_g, HW = g3.shape
    F_l = x3.shape[1]
    F_int = wg.shape[0]
    io_bytes = jnp.dtype(x3.dtype).itemsize
    M = N * HW

    grid = (N, HW // tm)
    data_map = lambda n, m: (n, 0, m)
    full2 = lambda n, m: (0, 0)

    cost = pl.CostEstimate(
        flops=2 * M * F_int * (F_g + F_l) + M * (3 * F_int + F_l),
        transcendentals=M,
        bytes_accessed=io_bytes * M * (F_g + 2 * F_l)
        + 4 * (F_int * (F_g + F_l + 2) + 1),
    )

    return pl.pallas_call(
        _attention_kernel,
        out_shape=jax.ShapeDtypeStruct((N, F_l, HW), x3.dtype),
        grid_spec=pltpu.PrefetchScalarGridSpec(
            num_scalar_prefetch=0,
            grid=grid,
            in_specs=[
                pl.BlockSpec((None, F_g, tm), data_map),    # g tile (F_g, tm)
                pl.BlockSpec((None, F_l, tm), data_map),    # x tile (F_l, tm)
                pl.BlockSpec((F_int, F_g), full2),          # folded W_g
                pl.BlockSpec((F_int, F_l), full2),          # folded W_x
                pl.BlockSpec((F_int, 1), full2),            # bg + bx combined
                pl.BlockSpec((F_int, 1), full2),            # folded psi weight
                pl.BlockSpec(memory_space=pltpu.MemorySpace.SMEM),  # psi bias
            ],
            out_specs=pl.BlockSpec((None, F_l, tm), data_map),
        ),
        compiler_params=pltpu.CompilerParams(
            dimension_semantics=("parallel", "parallel")),
        cost_estimate=cost,
    )(g3, x3, wg, wx, bias, wpsi, bpsi)


# ----------------------------------------------------------------------------
# Parameter handling (PyTorch-style (Cout, Cin) 1x1 conv weights + BN folding)
# ----------------------------------------------------------------------------
def fold_bn(w, b, gamma, beta, mean, var, eps=1e-5):
    """Fold inference-mode BatchNorm into a 1x1 conv with weight (Cout, Cin)."""
    s = gamma / jnp.sqrt(var + eps)                # (Cout,)
    return w * s[:, None], b * s + (beta - mean * s)


def make_params(key, F_g, F_l, F_int):
    ks = jax.random.split(key, 9)
    p = {}
    # conv weights stored as (Cout, Cin) — same as PyTorch's (Cout, Cin, 1, 1)
    p["wg_w"] = jax.random.normal(ks[0], (F_int, F_g), jnp.float32) * 0.2
    p["wg_b"] = jax.random.normal(ks[1], (F_int,), jnp.float32) * 0.1
    p["wx_w"] = jax.random.normal(ks[2], (F_int, F_l), jnp.float32) * 0.2
    p["wx_b"] = jax.random.normal(ks[3], (F_int,), jnp.float32) * 0.1
    p["psi_w"] = jax.random.normal(ks[4], (1, F_int), jnp.float32) * 0.2
    p["psi_b"] = jax.random.normal(ks[5], (1,), jnp.float32) * 0.1

    def bn(k, c):
        k1, k2, k3, k4 = jax.random.split(k, 4)
        return dict(
            gamma=1.0 + 0.1 * jax.random.normal(k1, (c,), jnp.float32),
            beta=0.1 * jax.random.normal(k2, (c,), jnp.float32),
            mean=0.1 * jax.random.normal(k3, (c,), jnp.float32),
            var=1.0 + 0.1 * jax.random.uniform(k4, (c,), jnp.float32),
        )

    p["bn_g"] = bn(ks[6], F_int)
    p["bn_x"] = bn(ks[7], F_int)
    p["bn_psi"] = bn(ks[8], 1)
    return p


# ----------------------------------------------------------------------------
# Module-level forward (PyTorch-equivalent)
# ----------------------------------------------------------------------------
def attention_block(g_nchw, x_nchw, params, io_dtype=jnp.bfloat16):
    """g: (N,F_g,H,W), x: (N,F_l,H,W) -> (N,F_l,H,W) in io_dtype."""
    assert g_nchw.shape[2:] == x_nchw.shape[2:], \
        "bilinear-resize branch not implemented"  # TODO(synk): F.interpolate path
    N, F_g, H, W = g_nchw.shape
    F_l = x_nchw.shape[1]
    F_int = params["wg_w"].shape[0]
    HW = H * W

    wg, bg = fold_bn(params["wg_w"], params["wg_b"], **params["bn_g"])
    wx, bx = fold_bn(params["wx_w"], params["wx_b"], **params["bn_x"])
    wpsi, bpsi = fold_bn(params["psi_w"], params["psi_b"], **params["bn_psi"])

    # NCHW -> (N, C, H*W): pure reshape, no transpose / extra HBM pass.
    # (In a real model the upstream layers would already produce io_dtype.)
    g3 = g_nchw.reshape(N, F_g, HW).astype(io_dtype)
    x3 = x_nchw.reshape(N, F_l, HW).astype(io_dtype)

    # Pad spatial to a multiple of 128 so every vector store is unmasked,
    # lane-dense.  Padded pixels compute sigmoid(...)*0 == 0 and are sliced off.
    HWp = max(128, ((HW + 127) // 128) * 128)
    if HWp != HW:
        pad = HWp - HW
        g3 = jnp.pad(g3, ((0, 0), (0, 0), (0, pad)))
        x3 = jnp.pad(x3, ((0, 0), (0, 0), (0, pad)))

    io_bytes = jnp.dtype(io_dtype).itemsize
    tm = _pick_tm(HWp, F_g, F_l, F_int, io_bytes)

    out3 = _attention_call(
        g3, x3,
        wg.astype(io_dtype), wx.astype(io_dtype),
        (bg + bx).reshape(F_int, 1).astype(jnp.float32),
        wpsi.reshape(F_int, 1).astype(jnp.float32),
        bpsi.reshape(1).astype(jnp.float32),
        tm=tm,
    )
    if HWp != HW:
        out3 = out3[..., :HW]
    return out3.reshape(N, F_l, H, W)


def attention_block_ref(g_nchw, x_nchw, params, io_dtype=jnp.float32):
    """Pure-JAX reference (same math, same I/O quantization, no Pallas)."""
    wg, bg = fold_bn(params["wg_w"], params["wg_b"], **params["bn_g"])
    wx, bx = fold_bn(params["wx_w"], params["wx_b"], **params["bn_x"])
    wpsi, bpsi = fold_bn(params["psi_w"], params["psi_b"], **params["bn_psi"])
    g = g_nchw.astype(io_dtype).astype(jnp.float32)
    x = x_nchw.astype(io_dtype).astype(jnp.float32)
    wg = wg.astype(io_dtype).astype(jnp.float32)
    wx = wx.astype(io_dtype).astype(jnp.float32)
    hi = jax.lax.Precision.HIGHEST
    g1 = jnp.einsum("oc,nchw->nohw", wg, g, precision=hi) + bg[None, :, None, None]
    x1 = jnp.einsum("oc,nchw->nohw", wx, x, precision=hi) + bx[None, :, None, None]
    a = jnp.maximum(g1 + x1, 0.0)
    logit = jnp.einsum("oc,nchw->nohw", wpsi, a, precision=hi) + bpsi[None, :, None, None]
    psi = jax.nn.sigmoid(logit)
    return x * psi


if __name__ == "__main__":
    key = jax.random.PRNGKey(0)
    k_g, k_x, k_p = jax.random.split(key, 3)

    N, F_g, F_l, F_int, H, W = 2, 8, 4, 16, 16, 16
    g = jax.random.normal(k_g, (N, F_g, H, W), jnp.float32)
    x = jax.random.normal(k_x, (N, F_l, H, W), jnp.float32)
    params = make_params(k_p, F_g, F_l, F_int)

    # bf16 I/O path (default / production config: halves HBM traffic).
    out_bf16 = jax.block_until_ready(
        attention_block(g, x, params, io_dtype=jnp.bfloat16))
    ref_bf16 = attention_block_ref(g, x, params, io_dtype=jnp.bfloat16)
    assert out_bf16.shape == (N, F_l, H, W)
    assert jnp.allclose(out_bf16.astype(jnp.float32), ref_bf16,
                        atol=2e-2, rtol=2e-2), "bf16 mismatch vs reference"

    # f32 I/O path (tight numerical check of the fused math).
    out_f32 = jax.block_until_ready(
        attention_block(g, x, params, io_dtype=jnp.float32))
    ref_f32 = attention_block_ref(g, x, params, io_dtype=jnp.float32)
    assert jnp.allclose(out_f32, ref_f32,
                        atol=1e-4, rtol=1e-4), "f32 mismatch vs reference"

    print("KERNEL_OK")
</pallas_src>

<mosaic_0001>
module attributes {stable_mosaic.version = 11 : i64} {
  func.func @_attention_kernel(%arg0: i32, %arg1: i32, %arg2: memref<1x8x256xbf16, #tpu.memory_space<vmem>>, %arg3: memref<1x4x256xbf16, #tpu.memory_space<vmem>>, %arg4: memref<16x8xbf16, #tpu.memory_space<vmem>>, %arg5: memref<16x4xbf16, #tpu.memory_space<vmem>>, %arg6: memref<16x1xf32, #tpu.memory_space<vmem>>, %arg7: memref<16x1xf32, #tpu.memory_space<vmem>>, %arg8: memref<1xf32, #tpu.memory_space<smem>>, %arg9: memref<1x4x256xbf16, #tpu.memory_space<vmem>>) attributes {dimension_semantics = [#tpu.dimension_semantics<parallel>, #tpu.dimension_semantics<parallel>], iteration_bounds = array<i64: 2, 1>, scalar_prefetch = 0 : i64, scratch_operands = 0 : i64, tpu.core_type = #tpu.core_type<tc>, window_params = [{transform_indices = @transform_0, window_bounds = array<i64: 1, 8, 256>}, {transform_indices = @transform_1, window_bounds = array<i64: 1, 4, 256>}, {pipeline_mode = #tpu.pipeline_mode<synchronous>, transform_indices = @transform_2, window_bounds = array<i64: 16, 8>}, {pipeline_mode = #tpu.pipeline_mode<synchronous>, transform_indices = @transform_3, window_bounds = array<i64: 16, 4>}, {pipeline_mode = #tpu.pipeline_mode<synchronous>, transform_indices = @transform_4, window_bounds = array<i64: 16, 1>}, {pipeline_mode = #tpu.pipeline_mode<synchronous>, transform_indices = @transform_5, window_bounds = array<i64: 16, 1>}, {transform_indices = @transform_6, window_bounds = array<i64: 1>}, {transform_indices = @transform_7, window_bounds = array<i64: 1, 4, 256>}]} {
    %c0 = arith.constant 0 : index
    %c0_0 = arith.constant 0 : index
    %0 = vector.load %arg4[%c0, %c0_0] : memref<16x8xbf16, #tpu.memory_space<vmem>>, vector<16x8xbf16>
    %c0_1 = arith.constant 0 : index
    %c0_2 = arith.constant 0 : index
    %c0_3 = arith.constant 0 : index
    %1 = vector.load %arg2[%c0_1, %c0_2, %c0_3] : memref<1x8x256xbf16, #tpu.memory_space<vmem>>, vector<1x8x256xbf16>
    %2 = vector.shape_cast %1 : vector<1x8x256xbf16> to vector<8x256xbf16>
    %cst = arith.constant dense<0.000000e+00> : vector<16x256xf32>
    %3 = tpu.matmul %0, %2, %cst {dimension_numbers = #tpu.dot_dimension_numbers<[1], [0], [0], [1], [0, 0, 1, 1], [], []>} : vector<16x8xbf16>, vector<8x256xbf16>, vector<16x256xf32> -> vector<16x256xf32>
    %c0_4 = arith.constant 0 : index
    %c0_5 = arith.constant 0 : index
    %4 = vector.load %arg5[%c0_4, %c0_5] : memref<16x4xbf16, #tpu.memory_space<vmem>>, vector<16x4xbf16>
    %c0_6 = arith.constant 0 : index
    %c0_7 = arith.constant 0 : index
    %c0_8 = arith.constant 0 : index
    %5 = vector.load %arg3[%c0_6, %c0_7, %c0_8] : memref<1x4x256xbf16, #tpu.memory_space<vmem>>, vector<1x4x256xbf16>
    %6 = vector.shape_cast %5 : vector<1x4x256xbf16> to vector<4x256xbf16>
    %cst_9 = arith.constant dense<0.000000e+00> : vector<16x256xf32>
    %7 = tpu.matmul %4, %6, %cst_9 {dimension_numbers = #tpu.dot_dimension_numbers<[1], [0], [0], [1], [0, 0, 1, 1], [], []>} : vector<16x4xbf16>, vector<4x256xbf16>, vector<16x256xf32> -> vector<16x256xf32>
    %8 = arith.addf %3, %7 : vector<16x256xf32>
    %c0_10 = arith.constant 0 : index
    %c0_11 = arith.constant 0 : index
    %9 = vector.load %arg6[%c0_10, %c0_11] : memref<16x1xf32, #tpu.memory_space<vmem>>, vector<16x1xf32>
    %10 = vector.broadcast %9 : vector<16x1xf32> to vector<16x256xf32>
    %11 = arith.addf %8, %10 : vector<16x256xf32>
    %cst_12 = arith.constant 0.000000e+00 : f32
    %12 = vector.broadcast %cst_12 : f32 to vector<16x256xf32>
    %13 = arith.maximumf %11, %12 : vector<16x256xf32>
    %c0_13 = arith.constant 0 : index
    %c0_14 = arith.constant 0 : index
    %14 = vector.load %arg7[%c0_13, %c0_14] : memref<16x1xf32, #tpu.memory_space<vmem>>, vector<16x1xf32>
    %15 = vector.broadcast %14 : vector<16x1xf32> to vector<16x256xf32>
    %16 = arith.mulf %13, %15 : vector<16x256xf32>
    %cst_15 = arith.constant dense<0.000000e+00> : vector<256xf32>
    %17 = vector.multi_reduction <add>, %16, %cst_15 [0] : vector<16x256xf32> to vector<256xf32>
    %18 = vector.shape_cast %17 : vector<256xf32> to vector<1x256xf32>
    %c0_16 = arith.constant 0 : index
    %19 = memref.load %arg8[%c0_16] : memref<1xf32, #tpu.memory_space<smem>>
    %20 = vector.broadcast %19 : f32 to vector<1x256xf32>
    %21 = arith.addf %18, %20 : vector<1x256xf32>
    %22 = arith.negf %21 : vector<1x256xf32>
    %23 = math.exp %22 : vector<1x256xf32>
    %cst_17 = arith.constant 1.000000e+00 : f32
    %24 = vector.broadcast %cst_17 : f32 to vector<1x256xf32>
    %25 = arith.addf %24, %23 : vector<1x256xf32>
    %26 = arith.divf %24, %25 : vector<1x256xf32>
    %c0_18 = arith.constant 0 : index
    %c0_19 = arith.constant 0 : index
    %c0_20 = arith.constant 0 : index
    %27 = vector.load %arg3[%c0_18, %c0_19, %c0_20] : memref<1x4x256xbf16, #tpu.memory_space<vmem>>, vector<1x4x256xbf16>
    %28 = vector.shape_cast %27 : vector<1x4x256xbf16> to vector<4x256xbf16>
    %29 = arith.extf %28 : vector<4x256xbf16> to vector<4x256xf32>
    %30 = vector.broadcast %26 : vector<1x256xf32> to vector<4x256xf32>
    %31 = arith.mulf %29, %30 : vector<4x256xf32>
    %32 = arith.truncf %31 : vector<4x256xf32> to vector<4x256xbf16>
    %c0_21 = arith.constant 0 : index
    %c0_22 = arith.constant 0 : index
    %c0_23 = arith.constant 0 : index
    %33 = vector.load %arg9[%c0_21, %c0_22, %c0_23] : memref<1x4x256xbf16, #tpu.memory_space<vmem>>, vector<1x4x256xbf16>
    %34 = vector.shape_cast %33 : vector<1x4x256xbf16> to vector<4x256xbf16>
    %35 = vector.shape_cast %32 : vector<4x256xbf16> to vector<1x4x256xbf16>
    tpu.vector_store %arg9[%c0_21, %c0_22, %c0_23], %35 {strides = array<i32>} : memref<1x4x256xbf16, #tpu.memory_space<vmem>>, vector<1x4x256xbf16>,
    return
  }
  func.func @transform_0(%arg0: i32, %arg1: i32) -> (i32, i32, i32) {
    %c0_i32 = arith.constant 0 : i32
    %c0_i32_0 = arith.constant 0 : i32
    return %arg0, %c0_i32, %arg1 : i32, i32, i32
  }
  func.func @transform_1(%arg0: i32, %arg1: i32) -> (i32, i32, i32) {
    %c0_i32 = arith.constant 0 : i32
    %c0_i32_0 = arith.constant 0 : i32
    return %arg0, %c0_i32, %arg1 : i32, i32, i32
  }
  func.func @transform_2(%arg0: i32, %arg1: i32) -> (i32, i32) {
    %c0_i32 = arith.constant 0 : i32
    %c0_i32_0 = arith.constant 0 : i32
    %c0_i32_1 = arith.constant 0 : i32
    return %c0_i32, %c0_i32_0 : i32, i32
  }
  func.func @transform_3(%arg0: i32, %arg1: i32) -> (i32, i32) {
    %c0_i32 = arith.constant 0 : i32
    %c0_i32_0 = arith.constant 0 : i32
    %c0_i32_1 = arith.constant 0 : i32
    return %c0_i32, %c0_i32_0 : i32, i32
  }
  func.func @transform_4(%arg0: i32, %arg1: i32) -> (i32, i32) {
    %c0_i32 = arith.constant 0 : i32
    %c0_i32_0 = arith.constant 0 : i32
    %c0_i32_1 = arith.constant 0 : i32
    return %c0_i32, %c0_i32_0 : i32, i32
  }
  func.func @transform_5(%arg0: i32, %arg1: i32) -> (i32, i32) {
    %c0_i32 = arith.constant 0 : i32
    %c0_i32_0 = arith.constant 0 : i32
    %c0_i32_1 = arith.constant 0 : i32
    return %c0_i32, %c0_i32_0 : i32, i32
  }
  func.func @transform_6(%arg0: i32, %arg1: i32) -> i32 {
    %c0_i32 = arith.constant 0 : i32
    %c0_i32_0 = arith.constant 0 : i32
    return %c0_i32 : i32
  }
  func.func @transform_7(%arg0: i32, %arg1: i32) -> (i32, i32, i32) {
    %c0_i32 = arith.constant 0 : i32
    %c0_i32_0 = arith.constant 0 : i32
    return %arg0, %c0_i32, %arg1 : i32, i32, i32
  }
}

</mosaic_0001>

<bundles_post_ra>
// kernel: _attention_call.1
= control target key start
LH: loop header
LB: loop body
LE: loop exit
PB: predicated region body
PF: predicated region fallthrough
CT: control target
= control target key end

     0   :  { %s1052_s0 = inlined_call_operand.vmem [shape: bf16[2,8,256], index: 0, kind: input, shape index: {}]   ;;  %s1053_s1 = inlined_call_operand.vmem [shape: bf16[2,4,256], index: 1, kind: input, shape index: {}]   ;;  %s1054_s2 = inlined_call_operand.vmem [shape: bf16[16,8], index: 2, kind: input, shape index: {}]   ;;  %s1055_s3 = inlined_call_operand.vmem [shape: bf16[16,4], index: 3, kind: input, shape index: {}]   ;;  %s1056_s4 = inlined_call_operand.vmem [shape: f32[16,1], index: 4, kind: input, shape index: {}]   ;;  %s1057_s5 = inlined_call_operand.vmem [shape: f32[16,1], index: 5, kind: input, shape index: {}]   ;;  %s1058_s6 = inlined_call_operand.<no memory space> [shape: f32[1], index: 6, kind: input, shape index: {}]   ;;  %s1059_s7 = inlined_call_operand.hbm [shape: bf16[2,4,256], index: 7, kind: output, shape index: {}]  }
   0x1   :  { %12 = sst [smem:[#allocation2]] %s1058_s6 }
   0x2   :  { %13 = vsyncpa [#allocation4], 0 }
   0x3   :  { %15 = vsyncpa [#allocation4 + $0x1], 0  ;;  %s915_s26 = smov 0   ;;  %s917_s27 = smov 0  }
   0x4   :  { %s919_s28 = smov 0   ;;  %s921_s29 = smov 0  }
   0x5   :  { %s923_s30 = smov 0   ;;  %s925_s8 = smov 0  }
   0x6 LB: > { %s684_s6 = sadd.s32 4294967295, %s867_s8   ;;  %s685_s9 = sadd.s32 4294967294, %s867_s8   ;;  %s867_s8 = sphi %s925_s8, %s21_s8   ;;  %s863_s30 = sphi %s923_s30, %s1066_s30   ;;  %s859_s29 = sphi %s921_s29, %s1065_s29   ;;  %s855_s28 = sphi %s919_s28, %s1064_s28   ;;  %s851_s27 = sphi %s917_s27, %s1063_s27   ;;  %s847_s26 = sphi %s915_s26, %s1062_s26  }
   0x7   : > { %s33_s10 = sadd.s32 1, %s863_s30  ;;  %s203_s11 = sadd.s32 1, %s855_s28 }
   0x8   : > { %p35_p0 = scmp.ge.s32.totalorder %s33_s10, 2  ;;  %p213_p1 = scmp.ne.s32.totalorder %s855_s28, %s851_s27 }
   0x9   : > { %p214_p2 = scmp.eq.s32.totalorder %s684_s6, 1  ;;  %p219_p3 = scmp.ne.s32.totalorder %s851_s27, %s847_s26 }
   0xa   : > { %s1068_s10 = smov (%p35_p0, %s33_s10), 0  ;;  %p220_p5 = scmp.eq.s32.totalorder %s685_s9, 1 }
   0xb   : > { %p955_p4 = por %p214_p2, %p213_p1  ;;  %s198_s13 = ssub.s32 %s863_s30, %s1068_s10 }
   0xc   : > { %p688_p6 = scmp.ge.s32.totalorder %s867_s8, 1  ;;  %p201_p7 = scmp.eq.s32.totalorder %s198_s13, 0 }
   0xd   : > { %p962_p8 = por %p220_p5, %p219_p3  ;;  %p279_p9 = scmp.lt.s32.totalorder %s867_s8, 3 }
   0xe   : > { %s968_s15 = scalar_select %p201_p7, %s855_s28, %s203_s11  }
   0xf   : > { %p280_p10 = pnand %p688_p6, %p279_p9 }
  0x10   : > { %p325_p11 = scmp.lt.s32.totalorder (!%p280_p10), %s859_s29, 1  ;;  %v361_v0 = vlaneseq (!%p280_p10)  ;;  %v869_v1 = vmov (!%p280_p10), 1983009808   ;;  %v870_v4 = vmov (!%p280_p10), 0   ;;  %v484_v6 = vld [vmem:[%s1056_s4] sm:$0xff] (!%p280_p10)  ;;  %v485_v9 = vld [vmem:[%s1056_s4 + $0x8] sm:$0xff] (!%p280_p10) }
  0x11   : > { %283 = sbr.rel (%p280_p10) target bundleno = 325 (0x145), region = 48  ;;  %v359_v2 = vunpack.c.l.s4 (!%p280_p10), %v869_v1  ;;  %473 = vmatprep.mubr.bf16.mxu0 (!%p280_p10), %v870_v4  ;;  %409 = vmatprep.mubr.bf16.mxu1 (!%p280_p10), %v870_v4  ;;  %v504_v7 = vld [vmem:[%s1057_s5] sm:$0xff] (!%p280_p10)  ;;  %v505_v10 = vld [vmem:[%s1057_s5 + $0x8] sm:$0xff] (!%p280_p10)  ;;  %vm434_vm0 = vcmask (!%p280_p10), 1043456   ;;  %vm370_vm1 = vcmask (!%p280_p10), 1041408   ;;  %vm430_vm2 = vcmask (!%p280_p10), 64512  }
  0x12   : > { %v362_v3 = vshrl.u32 (!%p280_p10), %v361_v0, 7  ;;  %775 = vset.pattern.permute.xlu0 (!%p280_p10), %v870_v4  ;;  %776 = vset.pattern.permute.xlu1 (!%p280_p10), %v870_v4  ;;  %v779_v19 = vld [vmem:[%s1054_s2] sm:$0xff] (!%p280_p10)   ;;  %vm366_vm3 = vcmask (!%p280_p10), 31744   ;;  %s534_s23 = sld [smem:[#allocation2]] (!%p280_p10)  ;;  %s321_s24 = sand.u32 (!%p280_p10), 1, %s851_s27  }
  0x13   : > { %v360_v5 = vunpack.c.0.s8 (!%p280_p10), %v359_v2  ;;  %488 = vperm.xlu0 (!%p280_p10), %775, %v484_v6   ;;  %508 = vperm.xlu1 (!%p280_p10), %776, %v504_v7   ;;  %v780_v20 = vld [vmem:[%s1055_s3] sm:$0xff] (!%p280_p10)   ;;  %s713_s6 = sshll.u32 (!%p280_p10), %s859_s29, 6  ;;  %s574_s19 = scalar_lea.sflag (!%p280_p10), [#allocation4], %s321_s24 }
  0x14   : > { %s1005_s18 = scalar_lea.hbm (!%p280_p10), %s1059_s7, %s713_s6 }
  0x15   : > { %v363_v8 = vsub.s32 (!%p280_p10), %v360_v5, %v362_v3 }
  0x17   : > { %493 = vperm.xlu0 (!%p280_p10), %775, %v485_v9   ;;  %513 = vperm.xlu1 (!%p280_p10), %776, %v505_v10  }
  0x18   : > { %s326_s16 = scalar_select %p325_p11, %s859_s29, 1  ;;  %v535_v60 = vstv %s534_s23 }
  0x19   : > { %s871_s29 = smov [#allocation3]  }
  0x1a   : > { %s711_s21 = sshll.u32 %s326_s16, 3  ;;  %s712_s22 = sshll.u32 %s326_s16, 2 }
  0x1b   : > { %s332_s25 = scalar_lea.vmem %s1052_s0, %s711_s21  ;;  %s342_s11 = scalar_lea.vmem %s1053_s1, %s712_s22 }
  0x1c   : > { %v348_v11 = vld [vmem:[%s332_s25] sm:$0xff]  ;;  %s689_s25 = sshll.u32 %s321_s24, 2  ;;  %s793_s20 = sshll.u32 %s871_s29, 4  ;;  %s794_s20 = int_to_ptr.vmem [resolvable:$false] %s793_s20 }
  0x1d   : > { %v990_v12 = vld [vmem:[%s342_s11] sm:$0xf]  ;;  %v699_v13 = vcombine.high %v348_v11, %v348_v11  ;;  %v698_v14 = vcombine.low %v348_v11, %v348_v11  ;;  %s323_s9 = scalar_lea.vmem [#allocation3], %s689_s25  ;;  %s795_s21 = scalar_lea.vmem %s794_s20, 128 }
  0x1e   : > { %v364_v15 = vrot.slane %v990_v12, %v363_v8  ;;  %v550_v9 = vunpack.c.l.bf16 %v990_v12  ;;  %s590_s11 = sshll.u32 %s323_s9, 4  ;;  %s1007_s11 = int_to_ptr.vmem [resolvable:$true] %s590_s11 }
  0x1f   : > { %700 = vmatprep.subr.msk.bf16.mxu0 %vm434_vm0, %v699_v13  ;;  %v436_v16 = vsel %vm434_vm0, %v698_v14, 0  ;;  %s789_s16 = scalar_lea.vmem %s1007_s11, 64  ;;  %p796_p1 = scmp.lt.s32.totalorder %s1007_s11, %s794_s20 }
  0x20   : > { %v365_v17 = vcombine.high %v364_v15, %v364_v15  ;;  %v372_v18 = vsel %vm370_vm1, %v364_v15, 0  ;;  %442 = vmatpush1.bf16.msra.mxu0 %v436_v16  ;;  %p790_p12 = scmp.ne.s32.totalorder %s1007_s11, %s789_s16  ;;  %p797_p2 = scmp.lt.s32.totalorder %s795_s21, %s789_s16 }
  0x22   : > { %695 = vmatprep.subr.msk.bf16.mxu1 %vm370_vm1, %v365_v17  ;;  %p791_p13 = pnand %p790_p12, %p955_p4  ;;  %p798_p3 = por %p797_p2, %p796_p1 }
  0x23   : > { %378 = vmatpush1.bf16.msra.mxu1 %v372_v18  ;;  %701 = vmatmul.mubr.msk.bf16.vlgmr.msra.gmra.mrb[0].mxu0 %vm430_vm2, %v779_v19 }
  0x24   : > { %p792_p0 = pneg %p791_p13 }
  0x26   : > { %696 = vmatmul.mubr.msk.bf16.vlgmr.msra.gmra.mrb[0].mxu1 %vm366_vm3, %v780_v20  ;;  %p799_p5 = pnand %p798_p3, %p792_p0 }
  0x92   : > { %v489_v21 = vpop.permute.xlu0 %488  ;;  %v509_v29 = vpop.permute.xlu1 %508 }
  0x96   : > { %v494_v35 = vpop.permute.xlu0 %493  ;;  %v514_v43 = vpop.permute.xlu1 %513 }
  0xf6   : > { %v475_v22 = vpop.f32.mrb[0].mxu0 }
  0xf7   : > { %v477_v23 = vpop.f32.mrb[1].mxu0 }
  0xf8   : > { %v479_v25 = vpop.f32.mrb[2].mxu0 }
  0xf9   : > { %v411_v24 = vpop.f32.mrb[0].mxu1  ;;  %v481_v28 = vpop.f32.mrb[3].mxu0 }
  0xfa   : > { %v476_v26 = vadd.f32 %v475_v22, %v411_v24  ;;  %v413_v27 = vpop.f32.mrb[1].mxu1 }
  0xfb   : > { %v478_v30 = vadd.f32 %v477_v23, %v413_v27  ;;  %v415_v31 = vpop.f32.mrb[2].mxu1 }
  0xfc   : > { %v496_v32 = vadd.f32 %v489_v21, %v476_v26  ;;  %v480_v33 = vadd.f32 %v479_v25, %v415_v31  ;;  %v417_v34 = vpop.f32.mrb[3].mxu1 }
  0xfd   : > { %v497_v36 = vadd.f32 %v489_v21, %v478_v30  ;;  %v482_v37 = vadd.f32 %v481_v28, %v417_v34 }
  0xfe   : > { %v500_v38 = vmax.f32 %v496_v32, 0.0  ;;  %v498_v39 = vadd.f32 %v494_v35, %v480_v33 }
  0xff   : > { %v501_v40 = vmax.f32 %v497_v36, 0.0  ;;  %v499_v41 = vadd.f32 %v494_v35, %v482_v37 }
 0x100   : > { %v502_v42 = vmax.f32 %v498_v39, 0.0  ;;  %v516_v45 = vmul.f32 %v509_v29, %v500_v38 }
 0x101   : > { %v503_v44 = vmax.f32 %v499_v41, 0.0  ;;  %v517_v47 = vmul.f32 %v509_v29, %v501_v40 }
 0x102   : > { %v518_v46 = vmul.f32 %v514_v43, %v502_v42 }
 0x103   : > { %v519_v48 = vmul.f32 %v514_v43, %v503_v44 }
 0x104   : > { %v520_v49 = vadd.f32 %v518_v46, %v516_v45 }
 0x105   : > { %v527_v50 = vadd.f32 %v519_v48, %v517_v47 }
 0x106   : > { %v521_v51 = vrot.slane %v520_v49, 4 }
 0x107   : > { %v528_v52 = vrot.slane %v527_v50, 4 }
 0x108   : > { %v522_v53 = vadd.f32 %v521_v51, %v520_v49 }
 0x109   : > { %v529_v54 = vadd.f32 %v528_v52, %v527_v50 }
 0x10a   : > { %v523_v55 = vrot.slane %v522_v53, 2 }
 0x10b   : > { %v530_v56 = vrot.slane %v529_v54, 2 }
 0x10c   : > { %v524_v57 = vadd.f32 %v523_v55, %v522_v53 }
 0x10d   : > { %v531_v58 = vadd.f32 %v530_v56, %v529_v54 }
 0x10e   : > { %v525_v59 = vrot.slane %v524_v57, 1 }
 0x10f   : > { %v532_v61 = vrot.slane %v531_v58, 1 }
 0x110   : > { %v526_v62 = vadd.f32 %v525_v59, %v524_v57 }
 0x111   : > { %v533_v63 = vadd.f32 %v532_v61, %v531_v58 }
 0x112   : > { %v536_v0 = vadd.f32 %v535_v60, %v526_v62 }
 0x113   : > { %v537_v1 = vadd.f32 %v535_v60, %v533_v63 }
 0x114   : > { %v702_v2 = vmul.f32 -1.442695, %v536_v0 }
 0x115   : > { %v703_v3 = vmul.f32 -1.442695, %v537_v1 }
 0x116   : > { %781 = vpow2.f32 %v702_v2 }
 0x117   : > { %783 = vpow2.f32 %v703_v3 }
 0x120   : > { %v782_v4 = vpop.eup %781 }
 0x121   : > { %v784_v5 = vpop.eup %783  ;;  %v544_v6 = vadd.f32 1.0, %v782_v4 }
 0x122   : > { %v545_v7 = vadd.f32 1.0, %v784_v5 }
 0x123   : > { %785 = vrcp.f32 %v544_v6 }
 0x124   : > { %787 = vrcp.f32 %v545_v7 }
 0x12d   : > { %v786_v8 = vpop.eup %785 }
 0x12e   : > { %v788_v10 = vpop.eup %787 }
 0x12f   : > { %v553_v11 = vcombine.low %v786_v8, %v788_v10 }
 0x131   : > { %v555_v13 = vmul.f32 %v553_v11, %v550_v9 }
 0x133   : > { %v557_v14 = vcombine.high %v555_v13, %v555_v13 }
 0x135   : > { %v704_v15 = vpack.c.bf16 %v557_v14, %v555_v13 }
 0x137   : > { %705 = vst.sshfl [vmem:[%s323_s9] sm:$0x33 pattern:$0x76325410] %v704_v15 }
 0x138   : > { %802 = shalt.err (!%p799_p5)
}
 0x139   : > { %s803_s22 = scalar_lea.hbm %s1005_s18, 64  ;;  %s807_s25 = scalar_lea.hbm %s1059_s7, 128 }
 0x13a   : > { %p804_p6 = scmp.ne.s32.totalorder %s1005_s18, %s803_s22  ;;  %p808_p10 = scmp.lt.u32.totalorder %s1005_s18, %s1059_s7 }
 0x13b   : > { %p809_p11 = scmp.lt.u32.totalorder %s807_s25, %s803_s22  ;;  %p811_p13 = scmp.lt.u32.totalorder %s803_s22, %s1005_s18 }
 0x13c   : > { %p805_p7 = pnand %p804_p6, %p955_p4 }
 0x13d   : > { %p810_p12 = por %p809_p11, %p808_p10 }
 0x13e   : > { %p806_p9 = pneg %p805_p7 }
 0x13f   : > { %p812_p0 = por %p811_p13, %p810_p12 }
 0x141   : > { %p813_p1 = pnand %p812_p0, %p806_p9 }
 0x143   : > { %816 = shalt.err (!%p813_p1)
}
 0x144   : > { %718 = dma.vmem_to_hbm [thread:$0]  (%p955_p4), %s1007_s11, 64, %s1005_s18, %s574_s19  }
 0x145 PF: > { %p724_p2 = scmp.ge.s32.totalorder %s867_s8, 2  ;;  %s602_s13 = sand.u32 1, %s847_s26  }
 0x146   : > { %s603_s17 = scalar_lea.sflag [#allocation4], %s602_s13 }
 0x147   : > { %p721_p3 = pnand %p724_p2, %p962_p8 }
 0x149   : > { %842 = dma.done.wait (!%p721_p3), %s603_s17, 64  }
 0x14a   : > { %844 = vsyncadd (!%p721_p3), %s603_s17, 4294967232  ;;  %s21_s8 = sadd.s32 1, %s867_s8   ;;  %s1062_s26 = smov %s851_s27 }
 0x14b   : > { %p18_p5 = scmp.ge.s32.totalorder %s21_s8, 4   ;;  %s1063_s27 = smov %s855_s28 }
 0x14c   : > { %s1064_s28 = smov %s968_s15  ;;  %s1065_s29 = smov %s863_s30 }
 0x14d   : > { %s1066_s30 = smov %s1068_s10  ;;  %20 = sbr.rel (!%p18_p5) target bundleno = 6 (0x6), region = 86 }
 0x154   :  { %608 = vsyncpa [#allocation4], 1 }
 0x155   :  { %610 = vsyncpa [#allocation4 + $0x1], 1 }

</bundles_post_ra>
